<compile_context>
chip_gen: v7x
topology: tpu7x:2x2x1
jax: 0.10.0
libtpu: 0.0.40
codegen_flags: <defaults>
</compile_context>

<pallas_src>
import functools

import jax
import jax.numpy as jnp
import numpy as np
from jax.experimental import pallas as pl
from jax.experimental.pallas import tpu as pltpu

_NUM_POOLS = 21  # 1*1 + 2*2 + 4*4


def _adaptive_pool_matrix(H, W, ks=(1, 2, 4)):
    """(H*W, sum(k*k)) averaging matrix; columns follow PyTorch adaptive-pool bins."""
    cols = []
    for k in ks:
        hb = [(int(np.floor(i * H / k)), int(np.ceil((i + 1) * H / k))) for i in range(k)]
        wb = [(int(np.floor(j * W / k)), int(np.ceil((j + 1) * W / k))) for j in range(k)]
        for i in range(k):
            for j in range(k):
                h0, h1 = hb[i]
                w0, w1 = wb[j]
                m = np.zeros((H, W), np.float32)
                m[h0:h1, w0:w1] = 1.0 / float((h1 - h0) * (w1 - w0))
                cols.append(m.reshape(-1))
    return np.stack(cols, axis=1).astype(np.float32)


def _pick_b_tile(b, c, s, max_tile=8, block_byte_budget=4 << 20):
    """Largest divisor of b that (a) keeps >= 2 grid steps when b >= 2 (v7x dual-TC),
    (b) stays under a per-block VMEM budget, and (c) allows the layout-free
    (B, c, S) -> (B*c, S) collapse (needs c % 8 == 0)."""
    if c % 8 != 0:
        return 1
    per_b_bytes = c * s * 4
    cap = min(max_tile,
              b if b < 2 else max(1, b // 2),
              max(1, block_byte_budget // max(per_b_bytes, 1)))
    for t in range(cap, 0, -1):
        if b % t == 0:
            return t
    return 1


def spa_kernel(x_ref, pool_ref, w1_ref, w2_ref, o_ref, *, b_tile, hid):
    B, C, S = x_ref.shape
    xf = x_ref[...].astype(jnp.float32)                    # (B, C, S), lane-dense in S

    # ---- pyramid pooling: one MXU matmul over the spatial axis ----------------
    if b_tile == 1:
        x2 = xf[0]                                         # (C, S)
    else:
        x2 = xf.reshape(B * C, S)                          # layout-free (c % 8 == 0)
    pooled = jnp.dot(x2, pool_ref[...],
                     preferred_element_type=jnp.float32)   # (B*C, 21)
    pooled = pooled[None] if b_tile == 1 else pooled.reshape(B, C, _NUM_POOLS)

    # ---- fc1 (ReLU) + fc2 (sigmoid), hidden width statically unrolled ---------
    # Channel axis stays in sublanes the whole way: lane reduce (21-wide pool
    # axis) then sublane reduce (channels); result is re-broadcast by the VPU.
    w1 = w1_ref[...]                                       # (hid, C, 21)
    w2 = w2_ref[...]                                       # (hid, C, 1)
    gate_logits = jnp.zeros((B, C, 1), jnp.float32)
    for j in range(hid):
        hj = jnp.sum(pooled * w1[j][None, :, :], axis=2, keepdims=True)  # (B,C,1)
        hj = jnp.sum(hj, axis=1, keepdims=True)                          # (B,1,1)
        hj = jnp.maximum(hj, 0.0)                                        # ReLU
        gate_logits = gate_logits + hj * w2[j][None, :, :]               # (B,C,1)
    gate = jax.nn.sigmoid(gate_logits)                                   # (B,C,1) -> EUP

    o_ref[...] = (xf * gate).astype(o_ref.dtype)           # lane-broadcast rescale


@jax.jit
def spa_layer_pallas(x, W1, W2):
    """x: (b, c, H, W) NCHW.  W1: (hid, 21*c) PyTorch layout.  W2: (c, hid). No biases."""
    b, c, H, W = x.shape
    hid = W1.shape[0]
    S = H * W

    x3 = x.reshape(b, c, S)                                # free reshape (contiguous NCHW)
    pool_mat = jnp.asarray(_adaptive_pool_matrix(H, W))    # (S, 21), trace-time constant

    # Permute W1 columns into the kernel's pooled (c, 21) layout:
    #   y = cat([pool1 (c)], [pool2 (c,2,2) channel-major], [pool4 (c,4,4) channel-major])
    w_a = W1[:, :c]                                        # (hid, c)      p = 0
    w_b = W1[:, c:5 * c].reshape(hid, c, 4)                # (hid, c, 4)   p = 1..4
    w_c = W1[:, 5 * c:21 * c].reshape(hid, c, 16)          # (hid, c, 16)  p = 5..20
    w1f = jnp.concatenate([w_a[:, :, None], w_b, w_c], axis=2)  # (hid, c, 21)
    w2f = W2.T.reshape(hid, c, 1)                          # (hid, c, 1)

    bt = _pick_b_tile(b, c, S)
    kernel = functools.partial(spa_kernel, b_tile=bt, hid=hid)

    itemsize = jnp.dtype(x.dtype).itemsize
    cost = pl.CostEstimate(
        flops=2 * b * c * S * _NUM_POOLS           # pooling matmul
              + 2 * b * hid * c * _NUM_POOLS       # fc1
              + 2 * b * hid * c                    # fc2
              + b * c * S,                         # rescale
        transcendentals=b * c,                     # sigmoid
        bytes_accessed=2 * b * c * S * itemsize
                       + (S * _NUM_POOLS + hid * c * (_NUM_POOLS + 1)) * 4,
    )

    out3 = pl.pallas_call(
        kernel,
        out_shape=jax.ShapeDtypeStruct((b, c, S), x.dtype),
        grid_spec=pltpu.PrefetchScalarGridSpec(
            num_scalar_prefetch=0,
            grid=(b // bt,),
            in_specs=[
                pl.BlockSpec((bt, c, S), lambda i: (i, 0, 0)),
                pl.BlockSpec((S, _NUM_POOLS), lambda i: (0, 0)),
                pl.BlockSpec((hid, c, _NUM_POOLS), lambda i: (0, 0, 0)),
                pl.BlockSpec((hid, c, 1), lambda i: (0, 0, 0)),
            ],
            out_specs=pl.BlockSpec((bt, c, S), lambda i: (i, 0, 0)),
        ),
        compiler_params=pltpu.CompilerParams(
            dimension_semantics=("parallel",)),
        cost_estimate=cost,
    )(x3, pool_mat, w1f, w2f)
    return out3.reshape(b, c, H, W)


def spa_layer_reference(x, W1, W2):
    """Pure-JAX emulation of the PyTorch forward (divisible H, W)."""
    b, c, H, W = x.shape

    def apool(k):
        return x.reshape(b, c, k, H // k, k, W // k).mean(axis=(3, 5))

    y1 = apool(1).reshape(b, c)
    y2 = apool(2).reshape(b, 4 * c)
    y3 = apool(4).reshape(b, 16 * c)
    y = jnp.concatenate([y1, y2, y3], axis=1)
    h = jnp.maximum(y @ W1.T, 0.0)
    g = jax.nn.sigmoid(h @ W2.T)
    return x * g[:, :, None, None]


if __name__ == "__main__":
    key = jax.random.PRNGKey(0)
    # Config 1: b=2  -> B_TILE=1, 2 parallel grid steps (dual-TC friendly).
    # Config 2: b=16 -> B_TILE=8, exercises the batched (B*c, S) matmul path.
    for (b, channel, H, W) in [(2, 32, 16, 16), (16, 32, 16, 16)]:
        reduction = 16
        hid = max(1, channel // reduction)
        kx, k1, k2, key = jax.random.split(key, 4)
        x = jax.random.normal(kx, (b, channel, H, W), dtype=jnp.float32)
        W1 = 0.1 * jax.random.normal(k1, (hid, channel * 21), dtype=jnp.float32)
        W2 = 0.1 * jax.random.normal(k2, (channel, hid), dtype=jnp.float32)

        out = jax.block_until_ready(spa_layer_pallas(x, W1, W2))
        ref = jax.block_until_ready(spa_layer_reference(x, W1, W2))
        np.testing.assert_allclose(np.asarray(out), np.asarray(ref),
                                   rtol=1e-4, atol=1e-5)
    print("KERNEL_OK")
</pallas_src>

<mosaic_0001>
module attributes {stable_mosaic.version = 11 : i64} {
  func.func @spa_kernel(%arg0: i32, %arg1: memref<1x32x256xf32, #tpu.memory_space<vmem>>, %arg2: memref<256x21xf32, #tpu.memory_space<vmem>>, %arg3: memref<2x32x21xf32, #tpu.memory_space<vmem>>, %arg4: memref<2x32x1xf32, #tpu.memory_space<vmem>>, %arg5: memref<1x32x256xf32, #tpu.memory_space<vmem>>) attributes {dimension_semantics = [#tpu.dimension_semantics<parallel>], iteration_bounds = array<i64: 2>, scalar_prefetch = 0 : i64, scratch_operands = 0 : i64, tpu.core_type = #tpu.core_type<tc>, window_params = [{transform_indices = @transform_0, window_bounds = array<i64: 1, 32, 256>}, {pipeline_mode = #tpu.pipeline_mode<synchronous>, transform_indices = @transform_1, window_bounds = array<i64: 256, 21>}, {pipeline_mode = #tpu.pipeline_mode<synchronous>, transform_indices = @transform_2, window_bounds = array<i64: 2, 32, 21>}, {pipeline_mode = #tpu.pipeline_mode<synchronous>, transform_indices = @transform_3, window_bounds = array<i64: 2, 32, 1>}, {transform_indices = @transform_4, window_bounds = array<i64: 1, 32, 256>}]} {
    %c0 = arith.constant 0 : index
    %c0_0 = arith.constant 0 : index
    %c0_1 = arith.constant 0 : index
    %0 = vector.load %arg1[%c0, %c0_0, %c0_1] : memref<1x32x256xf32, #tpu.memory_space<vmem>>, vector<1x32x256xf32>
    %1 = vector.shape_cast %0 : vector<1x32x256xf32> to vector<32x256xf32>
    %c0_2 = arith.constant 0 : index
    %c0_3 = arith.constant 0 : index
    %2 = vector.load %arg2[%c0_2, %c0_3] : memref<256x21xf32, #tpu.memory_space<vmem>>, vector<256x21xf32>
    %cst = arith.constant dense<0.000000e+00> : vector<32x21xf32>
    %3 = tpu.matmul %1, %2, %cst {dimension_numbers = #tpu.dot_dimension_numbers<[1], [0], [0], [1], [0, 0, 1, 1], [], []>} : vector<32x256xf32>, vector<256x21xf32>, vector<32x21xf32> -> vector<32x21xf32>
    %4 = vector.shape_cast %3 : vector<32x21xf32> to vector<1x32x21xf32>
    %c0_4 = arith.constant 0 : index
    %c0_5 = arith.constant 0 : index
    %c0_6 = arith.constant 0 : index
    %5 = vector.load %arg3[%c0_4, %c0_5, %c0_6] : memref<2x32x21xf32, #tpu.memory_space<vmem>>, vector<2x32x21xf32>
    %c0_7 = arith.constant 0 : index
    %c0_8 = arith.constant 0 : index
    %c0_9 = arith.constant 0 : index
    %6 = vector.load %arg4[%c0_7, %c0_8, %c0_9] : memref<2x32x1xf32, #tpu.memory_space<vmem>>, vector<2x32x1xf32>
    %cst_10 = arith.constant 0.000000e+00 : f32
    %7 = vector.broadcast %cst_10 : f32 to vector<1x32x1xf32>
    %8 = vector.extract_strided_slice %5 {offsets = [0, 0, 0], sizes = [1, 32, 21], strides = [1, 1, 1]} : vector<2x32x21xf32> to vector<1x32x21xf32>
    %9 = vector.shape_cast %8 : vector<1x32x21xf32> to vector<32x21xf32>
    %10 = vector.shape_cast %9 : vector<32x21xf32> to vector<1x32x21xf32>
    %11 = arith.mulf %4, %10 : vector<1x32x21xf32>
    %cst_11 = arith.constant dense<0.000000e+00> : vector<1x32xf32>
    %12 = vector.multi_reduction <add>, %11, %cst_11 [2] : vector<1x32x21xf32> to vector<1x32xf32>
    %13 = vector.shape_cast %12 : vector<1x32xf32> to vector<1x32x1xf32>
    %cst_12 = arith.constant dense<0.000000e+00> : vector<1x1xf32>
    %14 = vector.multi_reduction <add>, %13, %cst_12 [1] : vector<1x32x1xf32> to vector<1x1xf32>
    %15 = vector.shape_cast %14 : vector<1x1xf32> to vector<1x1x1xf32>
    %cst_13 = arith.constant 0.000000e+00 : f32
    %16 = vector.broadcast %cst_13 : f32 to vector<1x1x1xf32>
    %17 = arith.maximumf %15, %16 : vector<1x1x1xf32>
    %18 = vector.extract_strided_slice %6 {offsets = [0, 0, 0], sizes = [1, 32, 1], strides = [1, 1, 1]} : vector<2x32x1xf32> to vector<1x32x1xf32>
    %19 = vector.shape_cast %18 : vector<1x32x1xf32> to vector<32x1xf32>
    %20 = vector.shape_cast %19 : vector<32x1xf32> to vector<1x32x1xf32>
    %21 = vector.broadcast %17 : vector<1x1x1xf32> to vector<1x32x1xf32>
    %22 = arith.mulf %21, %20 : vector<1x32x1xf32>
    %23 = arith.addf %7, %22 : vector<1x32x1xf32>
    %24 = vector.extract_strided_slice %5 {offsets = [1, 0, 0], sizes = [1, 32, 21], strides = [1, 1, 1]} : vector<2x32x21xf32> to vector<1x32x21xf32>
    %25 = vector.shape_cast %24 : vector<1x32x21xf32> to vector<32x21xf32>
    %26 = vector.shape_cast %25 : vector<32x21xf32> to vector<1x32x21xf32>
    %27 = arith.mulf %4, %26 : vector<1x32x21xf32>
    %cst_14 = arith.constant dense<0.000000e+00> : vector<1x32xf32>
    %28 = vector.multi_reduction <add>, %27, %cst_14 [2] : vector<1x32x21xf32> to vector<1x32xf32>
    %29 = vector.shape_cast %28 : vector<1x32xf32> to vector<1x32x1xf32>
    %cst_15 = arith.constant dense<0.000000e+00> : vector<1x1xf32>
    %30 = vector.multi_reduction <add>, %29, %cst_15 [1] : vector<1x32x1xf32> to vector<1x1xf32>
    %31 = vector.shape_cast %30 : vector<1x1xf32> to vector<1x1x1xf32>
    %cst_16 = arith.constant 0.000000e+00 : f32
    %32 = vector.broadcast %cst_16 : f32 to vector<1x1x1xf32>
    %33 = arith.maximumf %31, %32 : vector<1x1x1xf32>
    %34 = vector.extract_strided_slice %6 {offsets = [1, 0, 0], sizes = [1, 32, 1], strides = [1, 1, 1]} : vector<2x32x1xf32> to vector<1x32x1xf32>
    %35 = vector.shape_cast %34 : vector<1x32x1xf32> to vector<32x1xf32>
    %36 = vector.shape_cast %35 : vector<32x1xf32> to vector<1x32x1xf32>
    %37 = vector.broadcast %33 : vector<1x1x1xf32> to vector<1x32x1xf32>
    %38 = arith.mulf %37, %36 : vector<1x32x1xf32>
    %39 = arith.addf %23, %38 : vector<1x32x1xf32>
    %40 = arith.negf %39 : vector<1x32x1xf32>
    %41 = math.exp %40 : vector<1x32x1xf32>
    %cst_17 = arith.constant 1.000000e+00 : f32
    %42 = vector.broadcast %cst_17 : f32 to vector<1x32x1xf32>
    %43 = arith.addf %42, %41 : vector<1x32x1xf32>
    %44 = arith.divf %42, %43 : vector<1x32x1xf32>
    %45 = vector.broadcast %44 : vector<1x32x1xf32> to vector<1x32x256xf32>
    %46 = arith.mulf %0, %45 : vector<1x32x256xf32>
    %c0_18 = arith.constant 0 : index
    %c0_19 = arith.constant 0 : index
    %c0_20 = arith.constant 0 : index
    %47 = vector.load %arg5[%c0_18, %c0_19, %c0_20] : memref<1x32x256xf32, #tpu.memory_space<vmem>>, vector<1x32x256xf32>
    tpu.vector_store %arg5[%c0_18, %c0_19, %c0_20], %46 {strides = array<i32>} : memref<1x32x256xf32, #tpu.memory_space<vmem>>, vector<1x32x256xf32>,
    return
  }
  func.func @transform_0(%arg0: i32) -> (i32, i32, i32) {
    %c0_i32 = arith.constant 0 : i32
    %c0_i32_0 = arith.constant 0 : i32
    %c0_i32_1 = arith.constant 0 : i32
    return %arg0, %c0_i32, %c0_i32_0 : i32, i32, i32
  }
  func.func @transform_1(%arg0: i32) -> (i32, i32) {
    %c0_i32 = arith.constant 0 : i32
    %c0_i32_0 = arith.constant 0 : i32
    %c0_i32_1 = arith.constant 0 : i32
    return %c0_i32, %c0_i32_0 : i32, i32
  }
  func.func @transform_2(%arg0: i32) -> (i32, i32, i32) {
    %c0_i32 = arith.constant 0 : i32
    %c0_i32_0 = arith.constant 0 : i32
    %c0_i32_1 = arith.constant 0 : i32
    %c0_i32_2 = arith.constant 0 : i32
    return %c0_i32, %c0_i32_0, %c0_i32_1 : i32, i32, i32
  }
  func.func @transform_3(%arg0: i32) -> (i32, i32, i32) {
    %c0_i32 = arith.constant 0 : i32
    %c0_i32_0 = arith.constant 0 : i32
    %c0_i32_1 = arith.constant 0 : i32
    %c0_i32_2 = arith.constant 0 : i32
    return %c0_i32, %c0_i32_0, %c0_i32_1 : i32, i32, i32
  }
  func.func @transform_4(%arg0: i32) -> (i32, i32, i32) {
    %c0_i32 = arith.constant 0 : i32
    %c0_i32_0 = arith.constant 0 : i32
    %c0_i32_1 = arith.constant 0 : i32
    return %arg0, %c0_i32, %c0_i32_0 : i32, i32, i32
  }
}

</mosaic_0001>

<bundles_post_ra>
// kernel: spa_layer_pallas.1
= control target key start
LH: loop header
LB: loop body
LE: loop exit
PB: predicated region body
PF: predicated region fallthrough
CT: control target
= control target key end

     0   :  { %s693_s15 = smov 0   ;;  %s911_s0 = inlined_call_operand.vmem [shape: f32[2,32,256], index: 0, kind: input, shape index: {}]   ;;  %s912_s1 = inlined_call_operand.vmem [shape: f32[256,21], index: 1, kind: input, shape index: {}]   ;;  %s913_s2 = inlined_call_operand.vmem [shape: f32[2,32,21], index: 2, kind: input, shape index: {}]   ;;  %s914_s3 = inlined_call_operand.vmem [shape: f32[2,32,1], index: 3, kind: input, shape index: {}]   ;;  %s915_s4 = inlined_call_operand.vmem [shape: f32[2,32,256], index: 4, kind: output, shape index: {}]  }
   0x1 LB: > { %s523_s16 = sadd.s32 4294967295, %s665_s15   ;;  %p527_p0 = scmp.ge.s32.totalorder %s665_s15, 1  ;;  %s665_s15 = sphi %s693_s15, %s14_s15  }
   0x2   : > { %p162_p1 = scmp.lt.s32.totalorder %s665_s15, 3 }
   0x4   : > { %p163_p2 = pnand %p527_p0, %p162_p1 }
   0x5   : > { %v222_v0 = vld [vmem:[%s912_s1 + $0x80] sm:$0xff] (!%p163_p2)  ;;  %v223_v1 = vld [vmem:[%s912_s1 + $0x88] sm:$0xff] (!%p163_p2)  ;;  %p188_p3 = scmp.lt.s32.totalorder (!%p163_p2), %s523_s16, 1  ;;  %v224_v5 = vld [vmem:[%s912_s1 + $0x90] sm:$0xff] (!%p163_p2)  ;;  %vm343_vm0 = vcmask (!%p163_p2), 171008  }
   0x6   : > { %166 = sbr.rel (%p163_p2) target bundleno = 599 (0x257), region = 36  ;;  %v206_v2 = vld [vmem:[%s912_s1] sm:$0xff] (!%p163_p2)  ;;  %v584_v3 = vpack.c.bf16 (!%p163_p2), %v223_v1, %v222_v0  ;;  %v207_v4 = vld [vmem:[%s912_s1 + $0x8] sm:$0xff] (!%p163_p2)  ;;  %v225_v6 = vld [vmem:[%s912_s1 + $0x98] sm:$0xff] (!%p163_p2) }
   0x7   : > { %v586_v7 = vpack.c.bf16 (!%p163_p2), %v207_v4, %v206_v2  ;;  %v588_v8 = vpack.c.bf16 (!%p163_p2), %v225_v6, %v224_v5  ;;  %v208_v9 = vld [vmem:[%s912_s1 + $0x10] sm:$0xff] (!%p163_p2)  ;;  %v209_v10 = vld [vmem:[%s912_s1 + $0x18] sm:$0xff] (!%p163_p2)  ;;  %v226_v11 = vld [vmem:[%s912_s1 + $0xa0] sm:$0xff] (!%p163_p2) }
   0x8   : > { %585 = vmatprep.subr.bf16.mxu0 (!%p163_p2), %v584_v3  ;;  %616 = vmatprep.subr.bf16.mxu1 (!%p163_p2), %v584_v3  ;;  %v227_v12 = vld [vmem:[%s912_s1 + $0xa8] sm:$0xff] (!%p163_p2)  ;;  %v590_v13 = vpack.c.bf16 (!%p163_p2), %v209_v10, %v208_v9  ;;  %v210_v15 = vld [vmem:[%s912_s1 + $0x20] sm:$0xff] (!%p163_p2)  ;;  %v228_v17 = vld [vmem:[%s912_s1 + $0xb0] sm:$0xff] (!%p163_p2) }
   0x9   : > { %587 = vmatpush3.bf16.msra.mxu0 (!%p163_p2), %v586_v7  ;;  %624 = vmatpush3.bf16.msra.mxu1 (!%p163_p2), %v586_v7  ;;  %v592_v14 = vpack.c.bf16 (!%p163_p2), %v227_v12, %v226_v11  ;;  %v211_v16 = vld [vmem:[%s912_s1 + $0x28] sm:$0xff] (!%p163_p2)  ;;  %v229_v18 = vld [vmem:[%s912_s1 + $0xb8] sm:$0xff] (!%p163_p2)  ;;  %v212_v21 = vld [vmem:[%s912_s1 + $0x30] sm:$0xff] (!%p163_p2) }
   0xa   : > { %589 = vmatprep.subr.bf16.mxu0 (!%p163_p2), %v588_v8  ;;  %617 = vmatprep.subr.bf16.mxu1 (!%p163_p2), %v588_v8  ;;  %v594_v19 = vpack.c.bf16 (!%p163_p2), %v211_v16, %v210_v15  ;;  %v596_v20 = vpack.c.bf16 (!%p163_p2), %v229_v18, %v228_v17  ;;  %v213_v22 = vld [vmem:[%s912_s1 + $0x38] sm:$0xff] (!%p163_p2)  ;;  %v230_v23 = vld [vmem:[%s912_s1 + $0xc0] sm:$0xff] (!%p163_p2)  ;;  %v231_v24 = vld [vmem:[%s912_s1 + $0xc8] sm:$0xff] (!%p163_p2) }
   0xb   : > { %v598_v27 = vpack.c.bf16 (!%p163_p2), %v213_v22, %v212_v21  ;;  %v600_v28 = vpack.c.bf16 (!%p163_p2), %v231_v24, %v230_v23  ;;  %v214_v29 = vld [vmem:[%s912_s1 + $0x40] sm:$0xff] (!%p163_p2)  ;;  %v215_v30 = vld [vmem:[%s912_s1 + $0x48] sm:$0xff] (!%p163_p2)  ;;  %v232_v31 = vld [vmem:[%s912_s1 + $0xd0] sm:$0xff] (!%p163_p2) }
   0xc   : > { %v233_v32 = vld [vmem:[%s912_s1 + $0xd8] sm:$0xff] (!%p163_p2)  ;;  %v602_v33 = vpack.c.bf16 (!%p163_p2), %v215_v30, %v214_v29  ;;  %v216_v35 = vld [vmem:[%s912_s1 + $0x50] sm:$0xff] (!%p163_p2)  ;;  %v234_v37 = vld [vmem:[%s912_s1 + $0xe0] sm:$0xff] (!%p163_p2)  ;;  %v667_v30 = vmov (!%p163_p2), 0  }
   0xd   : > { %s917_s16 = smov (!%p188_p3, %s523_s16), 1  ;;  %591 = vmatpush3.bf16.msra.mxu0 %v590_v13  ;;  %625 = vmatpush3.bf16.msra.mxu1 %v590_v13  ;;  %v604_v34 = vpack.c.bf16 %v233_v32, %v232_v31  ;;  %v217_v36 = vld [vmem:[%s912_s1 + $0x58] sm:$0xff]  ;;  %v235_v38 = vld [vmem:[%s912_s1 + $0xe8] sm:$0xff]  ;;  %v218_v41 = vld [vmem:[%s912_s1 + $0x60] sm:$0xff] }
   0xe   : > { %s538_s11 = sshll.u32 %s917_s16, 6  ;;  %593 = vmatprep.subr.bf16.mxu0 %v592_v14  ;;  %618 = vmatprep.subr.bf16.mxu1 %v592_v14  ;;  %v606_v39 = vpack.c.bf16 %v217_v36, %v216_v35  ;;  %v608_v40 = vpack.c.bf16 %v235_v38, %v234_v37  ;;  %v219_v42 = vld [vmem:[%s912_s1 + $0x68] sm:$0xff]  ;;  %v236_v43 = vld [vmem:[%s912_s1 + $0xf0] sm:$0xff]  ;;  %v237_v44 = vld [vmem:[%s912_s1 + $0xf8] sm:$0xff] }
   0xf   : > { %s751_s24 = scalar_lea.vmem %s911_s0, %s538_s11  ;;  %v610_v45 = vpack.c.bf16 %v219_v42, %v218_v41  ;;  %v612_v46 = vpack.c.bf16 %v237_v44, %v236_v43  ;;  %v220_v47 = vld [vmem:[%s912_s1 + $0x70] sm:$0xff]  ;;  %v221_v48 = vld [vmem:[%s912_s1 + $0x78] sm:$0xff]  ;;  %v327_v58 = vld [vmem:[%s913_s2 + $0x20] sm:$0xff]  ;;  %642 = vset.pattern.permute.xlu1 %v667_v30  ;;  %641 = vset.pattern.permute.xlu0 %v667_v30  ;;  %s197_s27 = scalar_lea.vmem %s915_s4, %s538_s11 }
  0x10   : > { %v766_v25 = vld [vmem:[%s751_s24 + $0x8] sm:$0xff]  ;;  %v614_v49 = vpack.c.bf16 %v221_v48, %v220_v47  ;;  %v816_v50 = vld [vmem:[%s751_s24] sm:$0xff]  ;;  %v822_v52 = vld [vmem:[%s751_s24 + $0x18] sm:$0xff] }
  0x11   : > { %302 = vmatprep.mubr.f32.mxu0 %v766_v25  ;;  %v770_v26 = vld [vmem:[%s751_s24 + $0x28] sm:$0xff]  ;;  %595 = vmatpush3.bf16.msra.mxu0 %v594_v19  ;;  %v819_v51 = vld [vmem:[%s751_s24 + $0x20] sm:$0xff]  ;;  %v825_v53 = vld [vmem:[%s751_s24 + $0x38] sm:$0xff] }
  0x12   : > { %626 = vmatpush3.bf16.msra.mxu1 %v594_v19  ;;  %597 = vmatprep.subr.bf16.mxu0 %v596_v20  ;;  %v831_v54 = vld [vmem:[%s751_s24 + $0x10] sm:$0xff]  ;;  %v323_v61 = vld [vmem:[%s913_s2] sm:$0xff]  ;;  %v328_v10 = vld [vmem:[%s913_s2 + $0x28] sm:$0xff] }
  0x13   : > { %619 = vmatprep.subr.bf16.mxu1 %v596_v20  ;;  %312 = vmatprep.mubr.f32.mxu1 %v770_v26  ;;  %v835_v55 = vld [vmem:[%s751_s24 + $0x30] sm:$0xff]  ;;  %v324_v11 = vld [vmem:[%s913_s2 + $0x8] sm:$0xff]  ;;  %v330_v20 = vld [vmem:[%s913_s2 + $0x38] sm:$0xff] }
  0x14   : > { %v329_v62 = vld [vmem:[%s913_s2 + $0x30] sm:$0xff]  ;;  %v326_v21 = vld [vmem:[%s913_s2 + $0x18] sm:$0xff] }
  0x15   : > { %599 = vmatpush3.bf16.msra.mxu0 %v598_v27  ;;  %v325_v63 = vld [vmem:[%s913_s2 + $0x10] sm:$0xff] }
  0x16   : > { %627 = vmatpush3.bf16.msra.mxu1 %v598_v27  ;;  %601 = vmatprep.subr.bf16.mxu0 %v600_v28 }
  0x17   : > { %620 = vmatprep.subr.bf16.mxu1 %v600_v28 }
  0x19   : > { %603 = vmatpush3.bf16.msra.mxu0 %v602_v33 }
  0x1a   : > { %628 = vmatpush3.bf16.msra.mxu1 %v602_v33  ;;  %605 = vmatprep.subr.bf16.mxu0 %v604_v34 }
  0x1b   : > { %621 = vmatprep.subr.bf16.mxu1 %v604_v34 }
  0x1d   : > { %607 = vmatpush3.bf16.msra.mxu0 %v606_v39 }
  0x1e   : > { %629 = vmatpush3.bf16.msra.mxu1 %v606_v39  ;;  %609 = vmatprep.subr.bf16.mxu0 %v608_v40 }
  0x1f   : > { %622 = vmatprep.subr.bf16.mxu1 %v608_v40 }
  0x21   : > { %611 = vmatpush3.bf16.msra.mxu0 %v610_v45 }
  0x22   : > { %630 = vmatpush3.bf16.msra.mxu1 %v610_v45  ;;  %613 = vmatprep.subr.bf16.mxu0 %v612_v46 }
  0x23   : > { %623 = vmatprep.subr.bf16.mxu1 %v612_v46 }
  0x25   : > { %615 = vmatpush3.bf16.msra.mxu0 %v614_v49 }
  0x26   : > { %631 = vmatpush3.bf16.msra.mxu1 %v614_v49 }
  0x28   : > { %303 = vmatmul.mubr.f32.vlgmr.msra.gmra.mrb[0].mxu0 %v816_v50 }
  0x29   : > { %313 = vmatmul.mubr.f32.vlgmr.msra.gmra.mrb[0].mxu1 %v819_v51  ;;  %307 = vmatprep.mubr.f32.mxu0 %v822_v52 }
  0x2a   : > { %317 = vmatprep.mubr.f32.mxu1 %v825_v53 }
  0x2c   : > { %308 = vmatmul.mubr.f32.gmra.mrb[2].mxu0 %v831_v54 }
  0x2d   : > { %318 = vmatmul.mubr.f32.gmra.mrb[2].mxu1 %v835_v55 }
  0xfb   : > { %v572_v56 = vpop.f32.mrb[0].mxu0 }
  0xfc   : > { %v578_v57 = vpop.f32.mrb[0].mxu1  ;;  %v573_v59 = vpop.f32.mrb[1].mxu0 }
  0xfd   : > { %v579_v60 = vpop.f32.mrb[1].mxu1  ;;  %v574_v0 = vadd.f32 %v573_v59, %v572_v56 }
  0xfe   : > { %v580_v1 = vadd.f32 %v579_v60, %v578_v57 }
  0xff   : > { %v575_v2 = vpop.f32.mrb[2].mxu0  ;;  %v374_v3 = vmul.f32 %v574_v0, %v327_v58  ;;  %v339_v4 = vmul.f32 %v574_v0, %v323_v61  ;;  %v335_v61 = vld [vmem:[%s914_s3 + $0x20] sm:$0xff] }
 0x100   : > { %v581_v5 = vpop.f32.mrb[2].mxu1  ;;  %v376_v6 = vmul.f32 %v580_v1, %v329_v62  ;;  %v341_v7 = vmul.f32 %v580_v1, %v325_v63  ;;  %v576_v8 = vpop.f32.mrb[3].mxu0  ;;  %v336_v62 = vld [vmem:[%s914_s3 + $0x28] sm:$0xff]  ;;  %v337_v1 = vld [vmem:[%s914_s3 + $0x30] sm:$0xff] }
 0x101   : > { %v582_v9 = vpop.f32.mrb[3].mxu1  ;;  %v378_v12 = vsel %vm343_vm0, %v374_v3, 0.0  ;;  %v344_v13 = vsel %vm343_vm0, %v339_v4, 0.0  ;;  %v577_v14 = vadd.f32 %v576_v8, %v575_v2  ;;  %v338_v2 = vld [vmem:[%s914_s3 + $0x38] sm:$0xff]  ;;  %v331_v3 = vld [vmem:[%s914_s3] sm:$0xff] }
 0x102   : > { %379 = vadd.xlane.f32.xlu1 %v378_v12  ;;  %345 = vadd.xlane.f32.xlu0 %v344_v13  ;;  %v583_v15 = vadd.f32 %v582_v9, %v581_v5  ;;  %v384_v16 = vsel %vm343_vm0, %v376_v6, 0.0  ;;  %v350_v17 = vsel %vm343_vm0, %v341_v7, 0.0  ;;  %v332_v5 = vld [vmem:[%s914_s3 + $0x8] sm:$0xff]  ;;  %v333_v6 = vld [vmem:[%s914_s3 + $0x10] sm:$0xff]  ;;  %v334_v7 = vld [vmem:[%s914_s3 + $0x18] sm:$0xff] }
 0x103   : > { %v375_v18 = vmul.f32 %v577_v14, %v328_v10  ;;  %v340_v19 = vmul.f32 %v577_v14, %v324_v11 }
 0x104   : > { %v377_v24 = vmul.f32 %v583_v15, %v330_v20  ;;  %v342_v27 = vmul.f32 %v583_v15, %v326_v21 }
 0x105   : > { %v381_v22 = vsel %vm343_vm0, %v375_v18, 0.0  ;;  %v347_v23 = vsel %vm343_vm0, %v340_v19, 0.0 }
 0x106   : > { %385 = vadd.xlane.f32.xlu1 %v384_v16  ;;  %351 = vadd.xlane.f32.xlu0 %v350_v17  ;;  %v387_v28 = vsel %vm343_vm0, %v377_v24, 0.0  ;;  %v353_v29 = vsel %vm343_vm0, %v342_v27, 0.0 }
 0x10a   : > { %382 = vadd.xlane.f32.xlu1 %v381_v22  ;;  %348 = vadd.xlane.f32.xlu0 %v347_v23 }
 0x10e   : > { %388 = vadd.xlane.f32.xlu1 %v387_v28  ;;  %354 = vadd.xlane.f32.xlu0 %v353_v29 }
 0x18f   : > { %v380_v31 = vpop.xlane.xlu1 %379  ;;  %v346_v32 = vpop.xlane.xlu0 %345 }
 0x193   : > { %v386_v33 = vpop.xlane.xlu1 %385  ;;  %v352_v34 = vpop.xlane.xlu0 %351 }
 0x197   : > { %v383_v35 = vpop.xlane.xlu1 %382  ;;  %v349_v36 = vpop.xlane.xlu0 %348 }
 0x198   : > { %v390_v37 = vadd.f32 %v383_v35, %v380_v31  ;;  %v356_v38 = vadd.f32 %v349_v36, %v346_v32 }
 0x19a   : > { %v391_v39 = vadd.f32 %v390_v37, %v386_v33  ;;  %v357_v40 = vadd.f32 %v356_v38, %v352_v34 }
 0x19b   : > { %v389_v41 = vpop.xlane.xlu1 %388  ;;  %v355_v42 = vpop.xlane.xlu0 %354 }
 0x19c   : > { %v392_v43 = vadd.f32 %v391_v39, %v389_v41  ;;  %v358_v44 = vadd.f32 %v357_v40, %v355_v42 }
 0x19e   : > { %v393_v45 = vrot.slane %v392_v43, 4  ;;  %v359_v46 = vrot.slane %v358_v44, 4 }
 0x1a0   : > { %v394_v47 = vadd.f32 %v393_v45, %v392_v43  ;;  %v360_v48 = vadd.f32 %v359_v46, %v358_v44 }
 0x1a2   : > { %v395_v49 = vrot.slane %v394_v47, 2  ;;  %v361_v56 = vrot.slane %v360_v48, 2 }
 0x1a4   : > { %v396_v57 = vadd.f32 %v395_v49, %v394_v47  ;;  %v362_v58 = vadd.f32 %v361_v56, %v360_v48 }
 0x1a6   : > { %v397_v59 = vrot.slane %v396_v57, 1  ;;  %v363_v60 = vrot.slane %v362_v58, 1 }
 0x1a8   : > { %v398_v63 = vadd.f32 %v397_v59, %v396_v57  ;;  %v364_v0 = vadd.f32 %v363_v60, %v362_v58 }
 0x1aa   : > { %v399_v4 = vmax.f32 %v398_v63, 0.0  ;;  %v365_v8 = vmax.f32 %v364_v0, 0.0 }
 0x1ac   : > { %v400_v9 = vmul.f32 %v399_v4, %v335_v61  ;;  %v401_v10 = vmul.f32 %v399_v4, %v336_v62  ;;  %v402_v11 = vmul.f32 %v399_v4, %v337_v1  ;;  %v403_v12 = vmul.f32 %v399_v4, %v338_v2 }
 0x1ad   : > { %v366_v13 = vmul.f32 %v365_v8, %v331_v3  ;;  %v367_v14 = vmul.f32 %v365_v8, %v332_v5  ;;  %v368_v15 = vmul.f32 %v365_v8, %v333_v6  ;;  %v369_v16 = vmul.f32 %v365_v8, %v334_v7 }
 0x1af   : > { %v404_v17 = vadd.f32 %v400_v9, %v366_v13  ;;  %v405_v18 = vadd.f32 %v401_v10, %v367_v14  ;;  %v406_v19 = vadd.f32 %v402_v11, %v368_v15  ;;  %v407_v20 = vadd.f32 %v403_v12, %v369_v16 }
 0x1b1   : > { %v532_v21 = vmul.f32 -1.442695, %v404_v17  ;;  %v533_v22 = vmul.f32 -1.442695, %v405_v18  ;;  %v534_v23 = vmul.f32 -1.442695, %v406_v19 }
 0x1b2   : > { %v535_v24 = vmul.f32 -1.442695, %v407_v20 }
 0x1b3   : > { %643 = vpow2.f32 %v532_v21 }
 0x1b4   : > { %645 = vpow2.f32 %v533_v22 }
 0x1b5   : > { %647 = vpow2.f32 %v534_v23 }
 0x1b6   : > { %649 = vpow2.f32 %v535_v24 }
 0x1bd   : > { %v644_v27 = vpop.eup %643 }
 0x1be   : > { %v646_v28 = vpop.eup %645  ;;  %v420_v29 = vadd.f32 1.0, %v644_v27 }
 0x1bf   : > { %v648_v30 = vpop.eup %647  ;;  %v421_v31 = vadd.f32 1.0, %v646_v28 }
 0x1c0   : > { %651 = vrcp.f32 %v420_v29  ;;  %v422_v32 = vadd.f32 1.0, %v648_v30  ;;  %v650_v33 = vpop.eup %649 }
 0x1c1   : > { %653 = vrcp.f32 %v421_v31  ;;  %v423_v34 = vadd.f32 1.0, %v650_v33 }
 0x1c2   : > { %655 = vrcp.f32 %v422_v32 }
 0x1c3   : > { %657 = vrcp.f32 %v423_v34 }
 0x1ca   : > { %v652_v35 = vpop.eup %651 }
 0x1cb   : > { %v654_v36 = vpop.eup %653  ;;  %434 = vperm.xlu0 %641, %v652_v35  }
 0x1cc   : > { %439 = vperm.xlu1 %642, %v654_v36   ;;  %v656_v37 = vpop.eup %655 }
 0x1cd   : > { %v658_v38 = vpop.eup %657 }
 0x1d0   : > { %444 = vperm.xlu1 %642, %v656_v37  }
 0x1d4   : > { %449 = vperm.xlu1 %642, %v658_v38  }
 0x24a   : > { %v435_v39 = vpop.permute.xlu0 %434 }
 0x24b   : > { %v440_v40 = vpop.permute.xlu1 %439  ;;  %v452_v41 = vmul.f32 %v435_v39, %v816_v50  ;;  %v453_v42 = vmul.f32 %v435_v39, %v766_v25 }
 0x24c   : > { %v454_v43 = vmul.f32 %v440_v40, %v831_v54  ;;  %v455_v44 = vmul.f32 %v440_v40, %v822_v52 }
 0x24d   : > { %460 = vst [vmem:[%s197_s27] sm:$0xff] %v452_v41  ;;  %461 = vst [vmem:[%s197_s27 + $0x8] sm:$0xff] %v453_v42 }
 0x24e   : > { %462 = vst [vmem:[%s197_s27 + $0x10] sm:$0xff] %v454_v43  ;;  %463 = vst [vmem:[%s197_s27 + $0x18] sm:$0xff] %v455_v44 }
 0x24f   : > { %v445_v45 = vpop.permute.xlu1 %444 }
 0x250   : > { %v456_v46 = vmul.f32 %v445_v45, %v819_v51  ;;  %v457_v47 = vmul.f32 %v445_v45, %v770_v26 }
 0x252   : > { %464 = vst [vmem:[%s197_s27 + $0x20] sm:$0xff] %v456_v46  ;;  %465 = vst [vmem:[%s197_s27 + $0x28] sm:$0xff] %v457_v47 }
 0x253   : > { %v450_v48 = vpop.permute.xlu1 %449 }
 0x254   : > { %v458_v50 = vmul.f32 %v450_v48, %v835_v55  ;;  %v459_v25 = vmul.f32 %v450_v48, %v825_v53 }
 0x256   : > { %466 = vst [vmem:[%s197_s27 + $0x30] sm:$0xff] %v458_v50  ;;  %467 = vst [vmem:[%s197_s27 + $0x38] sm:$0xff] %v459_v25 }
 0x257 PF: > { %s14_s15 = sadd.s32 1, %s665_s15  }
 0x258   : > { %p11_p4 = scmp.ge.s32.totalorder %s14_s15, 4  }
 0x25a   :  { %13 = sbr.rel (!%p11_p4) target bundleno = 1 (0x1), region = 66 }

</bundles_post_ra>
